<compile_context>
chip_gen: v7x
topology: tpu7x:2x2x1
jax: 0.10.0
libtpu: 0.0.40
codegen_flags: <defaults>
</compile_context>

<pallas_src>
import functools

import jax
import jax.numpy as jnp
from jax.experimental import pallas as pl
from jax.experimental.pallas import tpu as pltpu

LOG_STD_MAX = 2.0
LOG_STD_MIN = -20.0

HIDDEN = 256


def _round_up(x, m):
    return ((x + m - 1) // m) * m


# ---------------------------------------------------------------------------
# Kernel
# ---------------------------------------------------------------------------
def _policy_kernel(state_ref,
                   w1_ref, b1_ref,
                   w2_ref, b2_ref,
                   wh_ref, bh_ref,
                   out_ref, *, half):
    """One batch tile of the fused policy MLP.

    state_ref : (tile_b, obs_pad)      f32
    w1_ref    : (obs_pad, HIDDEN)      f32/bf16
    w2_ref    : (HIDDEN, HIDDEN)       f32/bf16
    wh_ref    : (HIDDEN, 2*half)       f32/bf16   (mean || log_std, zero padded)
    b*_ref    : (1, N)                 f32
    out_ref   : (tile_b, 2*half)       f32        lanes [0:act) = mean,
                                                  lanes [half:half+act) = log_std
    """
    cdt = w1_ref.dtype  # compute dtype fed to the MXU (f32 or bf16)

    x = state_ref[...].astype(cdt)

    # fc layer 1 + ReLU (MXU, f32 accumulation; bias added in f32)
    h1 = jnp.dot(x, w1_ref[...], preferred_element_type=jnp.float32) + b1_ref[...]
    h1 = jnp.maximum(h1, 0.0)

    # fc layer 2 + ReLU
    h2 = jnp.dot(h1.astype(cdt), w2_ref[...],
                 preferred_element_type=jnp.float32) + b2_ref[...]
    h2 = jnp.maximum(h2, 0.0)

    # fused heads: one matmul produces [mean | log_std_raw] side by side
    heads = jnp.dot(h2.astype(cdt), wh_ref[...],
                    preferred_element_type=jnp.float32) + bh_ref[...]

    # log_std transform: tanh -> affine into [LOG_STD_MIN, LOG_STD_MAX]
    ls = jnp.tanh(heads)
    ls = LOG_STD_MIN + 0.5 * (LOG_STD_MAX - LOG_STD_MIN) * (ls + 1.0)

    # lanes >= half hold the log_std head; lanes < half hold the mean head.
    lane = jax.lax.broadcasted_iota(jnp.int32, heads.shape, dimension=1)
    out_ref[...] = jnp.where(lane >= half, ls, heads).astype(out_ref.dtype)


# ---------------------------------------------------------------------------
# Wrapper
# ---------------------------------------------------------------------------
def pack_params(params, obs_dim, act_dim, weights_dtype=jnp.float32):
    """One-time packing/padding of the PyTorch-style parameters.

    - pads w1's K dim (obs_dim) up to a multiple of 128,
    - concatenates mean/log_std head weights into one lane-dense slab,
    - optionally casts weight matrices to bf16 (biases stay f32).
    """
    obs_pad = _round_up(obs_dim, 128)
    half = _round_up(act_dim, 64)          # mean lanes [0:half), log_std [half:2*half)
    out_w = 2 * half                       # multiple of 128 -> unmasked vst

    w1 = jnp.zeros((obs_pad, HIDDEN), jnp.float32).at[:obs_dim, :].set(params["w1"])

    w_heads = jnp.zeros((HIDDEN, out_w), jnp.float32)
    w_heads = w_heads.at[:, :act_dim].set(params["wm"])
    w_heads = w_heads.at[:, half:half + act_dim].set(params["ws"])

    b_heads = jnp.zeros((1, out_w), jnp.float32)
    b_heads = b_heads.at[:, :act_dim].set(params["bm"])
    b_heads = b_heads.at[:, half:half + act_dim].set(params["bs"])

    return {
        "w1": w1.astype(weights_dtype),
        "b1": params["b1"].astype(jnp.float32),
        "w2": params["w2"].astype(weights_dtype),
        "b2": params["b2"].astype(jnp.float32),
        "wh": w_heads.astype(weights_dtype),
        "bh": b_heads.astype(jnp.float32),
        "obs_dim": obs_dim,
        "obs_pad": obs_pad,
        "act_dim": act_dim,
        "half": half,
        "out_w": out_w,
    }


def gaussian_policy_forward(state, packed, *, batch_tile=256):
    """state: (B, obs_dim) f32. Returns (mean, log_std), each (B, act_dim)."""
    B = state.shape[0]
    obs_dim = packed["obs_dim"]
    obs_pad = packed["obs_pad"]
    act_dim = packed["act_dim"]
    half = packed["half"]
    out_w = packed["out_w"]

    # batch padding / tiling: tile batch up to the MXU row count, grid over the rest.
    pad_b8 = _round_up(B, 8)
    tile_b = min(pad_b8, batch_tile)
    pad_b = _round_up(pad_b8, tile_b)

    state_p = jnp.zeros((pad_b, obs_pad), jnp.float32)
    state_p = state_p.at[:B, :obs_dim].set(state.astype(jnp.float32))

    args = (state_p,
            packed["w1"], packed["b1"],
            packed["w2"], packed["b2"],
            packed["wh"], packed["bh"])

    grid = (pad_b // tile_b,)

    in_specs = [
        pl.BlockSpec((tile_b, obs_pad), lambda i: (i, 0)),      # state: tiled over batch
        pl.BlockSpec((obs_pad, HIDDEN), lambda i: (0, 0)),      # w1: VMEM-resident
        pl.BlockSpec((1, HIDDEN), lambda i: (0, 0)),            # b1
        pl.BlockSpec((HIDDEN, HIDDEN), lambda i: (0, 0)),       # w2
        pl.BlockSpec((1, HIDDEN), lambda i: (0, 0)),            # b2
        pl.BlockSpec((HIDDEN, out_w), lambda i: (0, 0)),        # fused head weights
        pl.BlockSpec((1, out_w), lambda i: (0, 0)),             # fused head bias
    ]
    out_specs = pl.BlockSpec((tile_b, out_w), lambda i: (i, 0))

    weight_bytes = sum(int(a.size) * a.dtype.itemsize for a in args[1:])
    flops = 2 * pad_b * (obs_pad * HIDDEN + HIDDEN * HIDDEN + HIDDEN * out_w)
    cost = pl.CostEstimate(
        flops=int(flops),
        transcendentals=int(pad_b * out_w),
        bytes_accessed=int(state_p.size * 4 + weight_bytes + pad_b * out_w * 4),
    )

    out = pl.pallas_call(
        functools.partial(_policy_kernel, half=half),
        out_shape=jax.ShapeDtypeStruct((pad_b, out_w), jnp.float32),
        grid=grid,
        in_specs=in_specs,
        out_specs=out_specs,
        compiler_params=pltpu.CompilerParams(
            dimension_semantics=("parallel",)),
        cost_estimate=cost,
    )(*args)

    mean = out[:B, :act_dim]
    log_std = out[:B, half:half + act_dim]
    return mean, log_std


# ---------------------------------------------------------------------------
# Init + pure-JAX reference
# ---------------------------------------------------------------------------
def init_params(key, obs_dim, act_dim):
    """Matches PyTorch module init shapes (fc: U(+-1/sqrt(fan_in)); heads: U(+-0.003))."""
    ks = jax.random.split(key, 8)
    init_w = 0.003

    def u(k, shape, bound):
        return jax.random.uniform(k, shape, jnp.float32, -bound, bound)

    b1 = 1.0 / jnp.sqrt(obs_dim)
    b2 = 1.0 / jnp.sqrt(HIDDEN)
    return {
        "w1": u(ks[0], (obs_dim, HIDDEN), b1),
        "b1": u(ks[1], (1, HIDDEN), b1),
        "w2": u(ks[2], (HIDDEN, HIDDEN), b2),
        "b2": u(ks[3], (1, HIDDEN), b2),
        "wm": u(ks[4], (HIDDEN, act_dim), init_w),
        "bm": u(ks[5], (1, act_dim), init_w),
        "ws": u(ks[6], (HIDDEN, act_dim), init_w),
        "bs": u(ks[7], (1, act_dim), init_w),
    }


def _reference_forward(state, p):
    h1 = jnp.maximum(state @ p["w1"] + p["b1"], 0.0)
    h2 = jnp.maximum(h1 @ p["w2"] + p["b2"], 0.0)
    mean = h2 @ p["wm"] + p["bm"]
    ls = jnp.tanh(h2 @ p["ws"] + p["bs"])
    ls = LOG_STD_MIN + 0.5 * (LOG_STD_MAX - LOG_STD_MIN) * (ls + 1.0)
    return mean, ls


if __name__ == "__main__":
    # humanoid-walk-like small dims: obs_dim=67, act_dim=21, batch=8
    B, OBS_DIM, ACT_DIM = 8, 67, 21

    key = jax.random.PRNGKey(0)
    k_state, k_params = jax.random.split(key)

    state = jax.random.normal(k_state, (B, OBS_DIM), dtype=jnp.float32)
    params = init_params(k_params, OBS_DIM, ACT_DIM)
    ref_mean, ref_log_std = _reference_forward(state, params)

    # f32 weight path: strict check against the reference.
    packed_f32 = pack_params(params, OBS_DIM, ACT_DIM, weights_dtype=jnp.float32)
    mean, log_std = gaussian_policy_forward(state, packed_f32)
    mean = jax.block_until_ready(mean)
    log_std = jax.block_until_ready(log_std)
    assert mean.shape == (B, ACT_DIM) and log_std.shape == (B, ACT_DIM)
    assert jnp.allclose(mean, ref_mean, atol=1e-5, rtol=1e-5)
    assert jnp.allclose(log_std, ref_log_std, atol=1e-5, rtol=1e-5)

    # bf16 weight path (v6e/v7x MXU fast path): loose check, f32 accumulation.
    packed_bf16 = pack_params(params, OBS_DIM, ACT_DIM, weights_dtype=jnp.bfloat16)
    mean_b, log_std_b = gaussian_policy_forward(state, packed_bf16)
    mean_b = jax.block_until_ready(mean_b)
    log_std_b = jax.block_until_ready(log_std_b)
    assert jnp.allclose(mean_b, ref_mean, atol=1e-1, rtol=1e-1)
    assert jnp.allclose(log_std_b, ref_log_std, atol=1e-1, rtol=1e-1)

    # TODO(synk): the `sample()` method (rsample + tanh-squash log-prob) is a
    # stochastic training-time path, not the forward(); it is left in plain JAX.
    print("KERNEL_OK")
</pallas_src>

<mosaic_0001>
module attributes {stable_mosaic.version = 11 : i64} {
  func.func @_policy_kernel(%arg0: i32, %arg1: memref<8x128xf32, #tpu.memory_space<vmem>>, %arg2: memref<128x256xf32, #tpu.memory_space<vmem>>, %arg3: memref<1x256xf32, #tpu.memory_space<vmem>>, %arg4: memref<256x256xf32, #tpu.memory_space<vmem>>, %arg5: memref<1x256xf32, #tpu.memory_space<vmem>>, %arg6: memref<256x128xf32, #tpu.memory_space<vmem>>, %arg7: memref<1x128xf32, #tpu.memory_space<vmem>>, %arg8: memref<8x128xf32, #tpu.memory_space<vmem>>) attributes {dimension_semantics = [#tpu.dimension_semantics<parallel>], iteration_bounds = array<i64: 1>, scalar_prefetch = 0 : i64, scratch_operands = 0 : i64, tpu.core_type = #tpu.core_type<tc>, window_params = [{transform_indices = @transform_0, window_bounds = array<i64: 8, 128>}, {pipeline_mode = #tpu.pipeline_mode<synchronous>, transform_indices = @transform_1, window_bounds = array<i64: 128, 256>}, {pipeline_mode = #tpu.pipeline_mode<synchronous>, transform_indices = @transform_2, window_bounds = array<i64: 1, 256>}, {pipeline_mode = #tpu.pipeline_mode<synchronous>, transform_indices = @transform_3, window_bounds = array<i64: 256, 256>}, {pipeline_mode = #tpu.pipeline_mode<synchronous>, transform_indices = @transform_4, window_bounds = array<i64: 1, 256>}, {pipeline_mode = #tpu.pipeline_mode<synchronous>, transform_indices = @transform_5, window_bounds = array<i64: 256, 128>}, {pipeline_mode = #tpu.pipeline_mode<synchronous>, transform_indices = @transform_6, window_bounds = array<i64: 1, 128>}, {transform_indices = @transform_7, window_bounds = array<i64: 8, 128>}]} {
    %c0 = arith.constant 0 : index
    %c0_0 = arith.constant 0 : index
    %0 = vector.load %arg1[%c0, %c0_0] : memref<8x128xf32, #tpu.memory_space<vmem>>, vector<8x128xf32>
    %c0_1 = arith.constant 0 : index
    %c0_2 = arith.constant 0 : index
    %1 = vector.load %arg2[%c0_1, %c0_2] : memref<128x256xf32, #tpu.memory_space<vmem>>, vector<128x256xf32>
    %cst = arith.constant dense<0.000000e+00> : vector<8x256xf32>
    %2 = tpu.matmul %0, %1, %cst {dimension_numbers = #tpu.dot_dimension_numbers<[1], [0], [0], [1], [0, 0, 1, 1], [], []>} : vector<8x128xf32>, vector<128x256xf32>, vector<8x256xf32> -> vector<8x256xf32>
    %c0_3 = arith.constant 0 : index
    %c0_4 = arith.constant 0 : index
    %3 = vector.load %arg3[%c0_3, %c0_4] : memref<1x256xf32, #tpu.memory_space<vmem>>, vector<1x256xf32>
    %4 = vector.broadcast %3 : vector<1x256xf32> to vector<8x256xf32>
    %5 = arith.addf %2, %4 : vector<8x256xf32>
    %cst_5 = arith.constant 0.000000e+00 : f32
    %6 = vector.broadcast %cst_5 : f32 to vector<8x256xf32>
    %7 = arith.maximumf %5, %6 : vector<8x256xf32>
    %c0_6 = arith.constant 0 : index
    %c0_7 = arith.constant 0 : index
    %8 = vector.load %arg4[%c0_6, %c0_7] : memref<256x256xf32, #tpu.memory_space<vmem>>, vector<256x256xf32>
    %cst_8 = arith.constant dense<0.000000e+00> : vector<8x256xf32>
    %9 = tpu.matmul %7, %8, %cst_8 {dimension_numbers = #tpu.dot_dimension_numbers<[1], [0], [0], [1], [0, 0, 1, 1], [], []>} : vector<8x256xf32>, vector<256x256xf32>, vector<8x256xf32> -> vector<8x256xf32>
    %c0_9 = arith.constant 0 : index
    %c0_10 = arith.constant 0 : index
    %10 = vector.load %arg5[%c0_9, %c0_10] : memref<1x256xf32, #tpu.memory_space<vmem>>, vector<1x256xf32>
    %11 = vector.broadcast %10 : vector<1x256xf32> to vector<8x256xf32>
    %12 = arith.addf %9, %11 : vector<8x256xf32>
    %cst_11 = arith.constant 0.000000e+00 : f32
    %13 = vector.broadcast %cst_11 : f32 to vector<8x256xf32>
    %14 = arith.maximumf %12, %13 : vector<8x256xf32>
    %c0_12 = arith.constant 0 : index
    %c0_13 = arith.constant 0 : index
    %15 = vector.load %arg6[%c0_12, %c0_13] : memref<256x128xf32, #tpu.memory_space<vmem>>, vector<256x128xf32>
    %cst_14 = arith.constant dense<0.000000e+00> : vector<8x128xf32>
    %16 = tpu.matmul %14, %15, %cst_14 {dimension_numbers = #tpu.dot_dimension_numbers<[1], [0], [0], [1], [0, 0, 1, 1], [], []>} : vector<8x256xf32>, vector<256x128xf32>, vector<8x128xf32> -> vector<8x128xf32>
    %c0_15 = arith.constant 0 : index
    %c0_16 = arith.constant 0 : index
    %17 = vector.load %arg7[%c0_15, %c0_16] : memref<1x128xf32, #tpu.memory_space<vmem>>, vector<1x128xf32>
    %18 = vector.broadcast %17 : vector<1x128xf32> to vector<8x128xf32>
    %19 = arith.addf %16, %18 : vector<8x128xf32>
    %20 = math.tanh %19 : vector<8x128xf32>
    %cst_17 = arith.constant 1.000000e+00 : f32
    %21 = vector.broadcast %cst_17 : f32 to vector<8x128xf32>
    %22 = arith.addf %20, %21 : vector<8x128xf32>
    %cst_18 = arith.constant 1.100000e+01 : f32
    %23 = vector.broadcast %cst_18 : f32 to vector<8x128xf32>
    %24 = arith.mulf %23, %22 : vector<8x128xf32>
    %cst_19 = arith.constant -2.000000e+01 : f32
    %25 = vector.broadcast %cst_19 : f32 to vector<8x128xf32>
    %26 = arith.addf %25, %24 : vector<8x128xf32>
    %27 = tpu.iota {dimensions = array<i32: 1>} : vector<8x128xi32>
    %c64_i32 = arith.constant 64 : i32
    %28 = vector.broadcast %c64_i32 : i32 to vector<8x128xi32>
    %29 = arith.cmpi sge, %27, %28 : vector<8x128xi32>
    %30 = arith.select %29, %26, %19 : vector<8x128xi1>, vector<8x128xf32>
    %c0_20 = arith.constant 0 : index
    %c0_21 = arith.constant 0 : index
    %31 = vector.load %arg8[%c0_20, %c0_21] : memref<8x128xf32, #tpu.memory_space<vmem>>, vector<8x128xf32>
    tpu.vector_store %arg8[%c0_20, %c0_21], %30 {strides = array<i32>} : memref<8x128xf32, #tpu.memory_space<vmem>>, vector<8x128xf32>,
    return
  }
  func.func @transform_0(%arg0: i32) -> (i32, i32) {
    %c0_i32 = arith.constant 0 : i32
    %c0_i32_0 = arith.constant 0 : i32
    return %arg0, %c0_i32 : i32, i32
  }
  func.func @transform_1(%arg0: i32) -> (i32, i32) {
    %c0_i32 = arith.constant 0 : i32
    %c0_i32_0 = arith.constant 0 : i32
    %c0_i32_1 = arith.constant 0 : i32
    return %c0_i32, %c0_i32_0 : i32, i32
  }
  func.func @transform_2(%arg0: i32) -> (i32, i32) {
    %c0_i32 = arith.constant 0 : i32
    %c0_i32_0 = arith.constant 0 : i32
    %c0_i32_1 = arith.constant 0 : i32
    return %c0_i32, %c0_i32_0 : i32, i32
  }
  func.func @transform_3(%arg0: i32) -> (i32, i32) {
    %c0_i32 = arith.constant 0 : i32
    %c0_i32_0 = arith.constant 0 : i32
    %c0_i32_1 = arith.constant 0 : i32
    return %c0_i32, %c0_i32_0 : i32, i32
  }
  func.func @transform_4(%arg0: i32) -> (i32, i32) {
    %c0_i32 = arith.constant 0 : i32
    %c0_i32_0 = arith.constant 0 : i32
    %c0_i32_1 = arith.constant 0 : i32
    return %c0_i32, %c0_i32_0 : i32, i32
  }
  func.func @transform_5(%arg0: i32) -> (i32, i32) {
    %c0_i32 = arith.constant 0 : i32
    %c0_i32_0 = arith.constant 0 : i32
    %c0_i32_1 = arith.constant 0 : i32
    return %c0_i32, %c0_i32_0 : i32, i32
  }
  func.func @transform_6(%arg0: i32) -> (i32, i32) {
    %c0_i32 = arith.constant 0 : i32
    %c0_i32_0 = arith.constant 0 : i32
    %c0_i32_1 = arith.constant 0 : i32
    return %c0_i32, %c0_i32_0 : i32, i32
  }
  func.func @transform_7(%arg0: i32) -> (i32, i32) {
    %c0_i32 = arith.constant 0 : i32
    %c0_i32_0 = arith.constant 0 : i32
    return %arg0, %c0_i32 : i32, i32
  }
}

</mosaic_0001>

<bundles_post_ra>
// kernel: tpu_custom_call.1
= control target key start
LH: loop header
LB: loop body
LE: loop exit
PB: predicated region body
PF: predicated region fallthrough
CT: control target
= control target key end

     0   :  { %12 = vsyncpa [#allocation3], 0  ;;  %s901_s0 = inlined_call_operand.hbm [shape: f32[8,128], index: 0, kind: input, shape index: {}]   ;;  %s902_s1 = inlined_call_operand.hbm [shape: f32[128,256], index: 1, kind: input, shape index: {}]   ;;  %s903_s2 = inlined_call_operand.vmem [shape: f32[1,256], index: 2, kind: input, shape index: {}]   ;;  %s904_s3 = inlined_call_operand.hbm [shape: f32[256,256], index: 3, kind: input, shape index: {}]   ;;  %s905_s4 = inlined_call_operand.vmem [shape: f32[1,256], index: 4, kind: input, shape index: {}]   ;;  %s906_s5 = inlined_call_operand.hbm [shape: f32[256,128], index: 5, kind: input, shape index: {}]   ;;  %s907_s6 = inlined_call_operand.vmem [shape: f32[1,128], index: 6, kind: input, shape index: {}]   ;;  %s908_s7 = inlined_call_operand.hbm [shape: f32[8,128], index: 7, kind: output, shape index: {}]  }
   0x1   :  { %13 = vsyncpa [#allocation6], 0 }
   0x2   :  { %14 = vsyncpa [#allocation9], 0 }
   0x3   :  { %15 = vsyncpa [#allocation4], 0  ;;  %s776_s24 = smov [#allocation5]   ;;  %s658_s28 = scalar_lea.hbm %s902_s1, 4096 }
   0x4   :  { %s31_s25 = sshll.u32 %s776_s24, 4  ;;  %p659_p0 = scmp.ne.s32.totalorder %s902_s1, %s658_s28  ;;  %s32_s25 = int_to_ptr.vmem [resolvable:$true] %s31_s25 }
   0x5   :  { %p662_p1 = scmp.lt.u32.totalorder %s658_s28, %s902_s1 }
   0x7   :  { %p664_p2 = pnand %p662_p1, %p659_p0 }
   0x9   :  { %667 = shalt.err (!%p664_p2)
}
   0xa   :  { %s668_s10 = scalar_lea.vmem %s32_s25, 4096  ;;  %p673_p4 = scmp.lt.s32.totalorder %s32_s25, %s32_s25 }
   0xb   :  { %p669_p3 = scmp.ne.s32.totalorder %s32_s25, %s668_s10  ;;  %p674_p5 = scmp.lt.s32.totalorder %s668_s10, %s668_s10 }
   0xd   :  { %p675_p6 = por %p674_p5, %p673_p4 }
   0xf   :  { %p676_p7 = pnand %p675_p6, %p669_p3 }
  0x11   :  { %679 = shalt.err (!%p676_p7)
}
  0x12   :  { %s777_s11 = smov 256   ;;  %s778_s12 = smov 16  }
  0x13   :  { %37 = dma.hbm_to_vmem [thread:$0]  %s902_s1, 4096, %s32_s25, [#allocation6], %s777_s11, %s777_s11, %s778_s12  }
  0x14   :  { %s779_s15 = smov [#allocation2]   ;;  %s780_s17 = smov [#allocation7]  }
  0x15   :  { %s22_s16 = sshll.u32 %s779_s15, 4  ;;  %s45_s18 = sshll.u32 %s780_s17, 4  ;;  %s23_s16 = int_to_ptr.vmem [resolvable:$true] %s22_s16  ;;  %s46_s18 = int_to_ptr.vmem [resolvable:$true] %s45_s18 }
  0x16   :  { %s680_s21 = scalar_lea.hbm %s901_s0, 128 }
  0x17   :  { %p681_p8 = scmp.ne.s32.totalorder %s901_s0, %s680_s21  ;;  %p684_p9 = scmp.lt.u32.totalorder %s680_s21, %s901_s0 }
  0x19   :  { %p686_p10 = pnand %p684_p9, %p681_p8 }
  0x1b   :  { %689 = shalt.err (!%p686_p10)
}
  0x1c   :  { %s690_s1 = scalar_lea.vmem %s23_s16, 128  ;;  %p695_p12 = scmp.lt.s32.totalorder %s23_s16, %s23_s16 }
  0x1d   :  { %p691_p11 = scmp.ne.s32.totalorder %s23_s16, %s690_s1  ;;  %p696_p13 = scmp.lt.s32.totalorder %s690_s1, %s690_s1 }
  0x1f   :  { %p697_p0 = por %p696_p13, %p695_p12 }
  0x21   :  { %p698_p1 = pnand %p697_p0, %p691_p11 }
  0x23   :  { %701 = shalt.err (!%p698_p1)
}
  0x24   :  { %25 = dma.hbm_to_vmem [thread:$0]  %s901_s0, 128, %s23_s16, [#allocation3]  }
  0x25   :  { %s702_s30 = scalar_lea.hbm %s904_s3, 8192 }
  0x26   :  { %p703_p2 = scmp.ne.s32.totalorder %s904_s3, %s702_s30  ;;  %p706_p3 = scmp.lt.u32.totalorder %s702_s30, %s904_s3 }
  0x28   :  { %p708_p4 = pnand %p706_p3, %p703_p2 }
  0x2a   :  { %711 = shalt.err (!%p708_p4)
}
  0x2b   :  { %s712_s14 = scalar_lea.vmem %s46_s18, 8192  ;;  %p717_p6 = scmp.lt.s32.totalorder %s46_s18, %s46_s18 }
  0x2c   :  { %p713_p5 = scmp.ne.s32.totalorder %s46_s18, %s712_s14  ;;  %p718_p7 = scmp.lt.s32.totalorder %s712_s14, %s712_s14 }
  0x2e   :  { %p719_p8 = por %p718_p7, %p717_p6 }
  0x30   :  { %p720_p9 = pnand %p719_p8, %p713_p5 }
  0x32   :  { %723 = shalt.err (!%p720_p9)
}
  0x33   :  { %51 = dma.hbm_to_vmem [thread:$0]  %s904_s3, 8192, %s46_s18, [#allocation6], %s777_s11, %s777_s11, %s778_s12  }
  0x34   :  { %s781_s16 = smov [#allocation8]   ;;  %s724_s21 = scalar_lea.hbm %s906_s5, 4096 }
  0x35   :  { %s59_s17 = sshll.u32 %s781_s16, 4  ;;  %p725_p10 = scmp.ne.s32.totalorder %s906_s5, %s724_s21  ;;  %s60_s17 = int_to_ptr.vmem [resolvable:$true] %s59_s17 }
  0x36   :  { %p728_p11 = scmp.lt.u32.totalorder %s724_s21, %s906_s5 }
  0x38   :  { %p730_p12 = pnand %p728_p11, %p725_p10 }
  0x3a   :  { %733 = shalt.err (!%p730_p12)
}
  0x3b   :  { %s734_s1 = scalar_lea.vmem %s60_s17, 4096  ;;  %p739_p0 = scmp.lt.s32.totalorder %s60_s17, %s60_s17 }
  0x3c   :  { %p735_p13 = scmp.ne.s32.totalorder %s60_s17, %s734_s1  ;;  %p740_p1 = scmp.lt.s32.totalorder %s734_s1, %s734_s1 }
  0x3e   :  { %p741_p2 = por %p740_p1, %p739_p0 }
  0x40   :  { %p742_p3 = pnand %p741_p2, %p735_p13 }
  0x42   :  { %745 = shalt.err (!%p742_p3)
}
  0x43   :  { %s782_s3 = smov 128   ;;  %s783_s11 = smov 8  }
  0x44   :  { %65 = dma.hbm_to_vmem [thread:$0]  %s906_s5, 4096, %s60_s17, [#allocation9], %s782_s3, %s782_s3, %s783_s11  }
  0x45   :  { %768 = dma.done.wait [#allocation3], 128  }
  0x46   :  { %769 = vsyncadd [#allocation3], 4294967168 }
  0x47   :  { %770 = dma.done.wait [#allocation6], 12288  }
  0x48   :  { %771 = vsyncadd [#allocation6], 4294955008 }
  0x49   :  { %772 = dma.done.wait [#allocation9], 4096  }
  0x4a   :  { %773 = vsyncadd [#allocation9], 4294963200  ;;  %v784_v0 = vmov 0.0   ;;  %v82_v1 = vld [vmem:[#allocation5 + $0x8] sm:$0xff]  ;;  %v84_v2 = vld [vmem:[#allocation5 + $0x18] sm:$0xff] }
  0x4b   :  { %189 = vmatprep.mubr.f32.mxu0 %v784_v0  ;;  %v81_v3 = vld [vmem:[#allocation5] sm:$0xff]  ;;  %v518_v4 = vpack.c.bf16 %v84_v2, %v82_v1  ;;  %v83_v5 = vld [vmem:[#allocation5 + $0x10] sm:$0xff]  ;;  %v86_v6 = vld [vmem:[#allocation5 + $0x28] sm:$0xff] }
  0x4c   :  { %v88_v7 = vld [vmem:[#allocation5 + $0x38] sm:$0xff]  ;;  %v520_v8 = vpack.c.bf16 %v83_v5, %v81_v3  ;;  %v85_v10 = vld [vmem:[#allocation5 + $0x20] sm:$0xff]  ;;  %v87_v11 = vld [vmem:[#allocation5 + $0x30] sm:$0xff] }
  0x4d   :  { %v522_v9 = vpack.c.bf16 %v88_v7, %v86_v6  ;;  %v90_v12 = vld [vmem:[#allocation5 + $0x48] sm:$0xff]  ;;  %519 = vmatprep.subr.bf16.mxu0 %v518_v4  ;;  %v92_v13 = vld [vmem:[#allocation5 + $0x58] sm:$0xff]  ;;  %v524_v14 = vpack.c.bf16 %v87_v11, %v85_v10  ;;  %v89_v16 = vld [vmem:[#allocation5 + $0x40] sm:$0xff] }
  0x4e   :  { %521 = vmatpush1.bf16.msra.mxu0 %v520_v8  ;;  %v526_v15 = vpack.c.bf16 %v92_v13, %v90_v12  ;;  %v91_v17 = vld [vmem:[#allocation5 + $0x50] sm:$0xff]  ;;  %v94_v18 = vld [vmem:[#allocation5 + $0x68] sm:$0xff]  ;;  %v96_v19 = vld [vmem:[#allocation5 + $0x78] sm:$0xff] }
  0x4f   :  { %523 = vmatprep.subr.bf16.mxu0 %v522_v9  ;;  %v528_v20 = vpack.c.bf16 %v91_v17, %v89_v16  ;;  %v530_v21 = vpack.c.bf16 %v96_v19, %v94_v18  ;;  %v93_v22 = vld [vmem:[#allocation5 + $0x60] sm:$0xff]  ;;  %v95_v23 = vld [vmem:[#allocation5 + $0x70] sm:$0xff]  ;;  %v98_v24 = vld [vmem:[#allocation5 + $0x88] sm:$0xff] }
  0x50   :  { %v100_v25 = vld [vmem:[#allocation5 + $0x98] sm:$0xff]  ;;  %v97_v26 = vld [vmem:[#allocation5 + $0x80] sm:$0xff]  ;;  %v99_v27 = vld [vmem:[#allocation5 + $0x90] sm:$0xff]  ;;  %v532_v31 = vpack.c.bf16 %v95_v23, %v93_v22 }
  0x51   :  { %v199_v28 = vld [vmem:[#allocation7 + $0x8] sm:$0xff]  ;;  %v201_v29 = vld [vmem:[#allocation7 + $0x18] sm:$0xff]  ;;  %v198_v30 = vld [vmem:[#allocation7] sm:$0xff]  ;;  %v534_v36 = vpack.c.bf16 %v100_v25, %v98_v24  ;;  %v536_v46 = vpack.c.bf16 %v99_v27, %v97_v26 }
  0x52   :  { %525 = vmatpush1.bf16.msra.mxu0 %v524_v14  ;;  %v550_v32 = vpack.c.bf16 %v201_v29, %v199_v28  ;;  %v200_v33 = vld [vmem:[#allocation7 + $0x10] sm:$0xff]  ;;  %v203_v34 = vld [vmem:[#allocation7 + $0x28] sm:$0xff]  ;;  %v205_v35 = vld [vmem:[#allocation7 + $0x38] sm:$0xff] }
  0x53   :  { %527 = vmatprep.subr.bf16.mxu0 %v526_v15  ;;  %v552_v37 = vpack.c.bf16 %v200_v33, %v198_v30  ;;  %v554_v38 = vpack.c.bf16 %v205_v35, %v203_v34  ;;  %v202_v39 = vld [vmem:[#allocation7 + $0x20] sm:$0xff]  ;;  %v204_v40 = vld [vmem:[#allocation7 + $0x30] sm:$0xff]  ;;  %v207_v41 = vld [vmem:[#allocation7 + $0x48] sm:$0xff] }
  0x54   :  { %v102_v42 = vld [vmem:[#allocation5 + $0xa8] sm:$0xff]  ;;  %v104_v43 = vld [vmem:[#allocation5 + $0xb8] sm:$0xff]  ;;  %551 = vmatprep.subr.bf16.mxu1 %v550_v32  ;;  %v556_v45 = vpack.c.bf16 %v204_v40, %v202_v39  ;;  %v101_v47 = vld [vmem:[#allocation5 + $0xa0] sm:$0xff] }
  0x55   :  { %v209_v44 = vld [vmem:[#allocation7 + $0x58] sm:$0xff]  ;;  %553 = vmatpush1.bf16.msra.mxu1 %v552_v37  ;;  %v206_v49 = vld [vmem:[#allocation7 + $0x40] sm:$0xff]  ;;  %v208_v50 = vld [vmem:[#allocation7 + $0x50] sm:$0xff]  ;;  %v538_v51 = vpack.c.bf16 %v104_v43, %v102_v42 }
  0x56   :  { %529 = vmatpush1.bf16.msra.mxu0 %v528_v20  ;;  %555 = vmatprep.subr.bf16.mxu1 %v554_v38  ;;  %v558_v48 = vpack.c.bf16 %v209_v44, %v207_v41  ;;  %v103_v52 = vld [vmem:[#allocation5 + $0xb0] sm:$0xff]  ;;  %v211_v53 = vld [vmem:[#allocation7 + $0x68] sm:$0xff]  ;;  %v213_v54 = vld [vmem:[#allocation7 + $0x78] sm:$0xff]  ;;  %v560_v57 = vpack.c.bf16 %v208_v50, %v206_v49 }
  0x57   :  { %531 = vmatprep.subr.bf16.mxu0 %v530_v21  ;;  %v106_v55 = vld [vmem:[#allocation5 + $0xc8] sm:$0xff]  ;;  %v108_v56 = vld [vmem:[#allocation5 + $0xd8] sm:$0xff]  ;;  %v540_v58 = vpack.c.bf16 %v103_v52, %v101_v47  ;;  %v105_v59 = vld [vmem:[#allocation5 + $0xc0] sm:$0xff]  ;;  %v562_v60 = vpack.c.bf16 %v213_v54, %v211_v53 }
  0x58   :  { %v210_v61 = vld [vmem:[#allocation7 + $0x60] sm:$0xff]  ;;  %v212_v62 = vld [vmem:[#allocation7 + $0x70] sm:$0xff]  ;;  %v542_v63 = vpack.c.bf16 %v108_v56, %v106_v55  ;;  %v215_v1 = vld [vmem:[#allocation7 + $0x88] sm:$0xff] }
  0x59   :  { %557 = vmatpush1.bf16.msra.mxu1 %v556_v45  ;;  %v107_v0 = vld [vmem:[#allocation5 + $0xd0] sm:$0xff]  ;;  %v217_v2 = vld [vmem:[#allocation7 + $0x98] sm:$0xff]  ;;  %v110_v3 = vld [vmem:[#allocation5 + $0xe8] sm:$0xff]  ;;  %v564_v5 = vpack.c.bf16 %v212_v62, %v210_v61 }
  0x5a   :  { %533 = vmatpush1.bf16.msra.mxu0 %v532_v31  ;;  %559 = vmatprep.subr.bf16.mxu1 %v558_v48  ;;  %v112_v4 = vld [vmem:[#allocation5 + $0xf8] sm:$0xff]  ;;  %v544_v6 = vpack.c.bf16 %v107_v0, %v105_v59  ;;  %v109_v7 = vld [vmem:[#allocation5 + $0xe0] sm:$0xff]  ;;  %v566_v8 = vpack.c.bf16 %v217_v2, %v215_v1  ;;  %v216_v10 = vld [vmem:[#allocation7 + $0x90] sm:$0xff] }
  0x5b   :  { %535 = vmatprep.subr.bf16.mxu0 %v534_v36  ;;  %v214_v9 = vld [vmem:[#allocation7 + $0x80] sm:$0xff]  ;;  %v546_v11 = vpack.c.bf16 %v112_v4, %v110_v3  ;;  %v111_v12 = vld [vmem:[#allocation5 + $0xf0] sm:$0xff]  ;;  %v219_v13 = vld [vmem:[#allocation7 + $0xa8] sm:$0xff] }
  0x5c   :  { %v221_v14 = vld [vmem:[#allocation7 + $0xb8] sm:$0xff]  ;;  %v568_v15 = vpack.c.bf16 %v216_v10, %v214_v9  ;;  %v548_v16 = vpack.c.bf16 %v111_v12, %v109_v7  ;;  %v218_v18 = vld [vmem:[#allocation7 + $0xa0] sm:$0xff]  ;;  %v220_v19 = vld [vmem:[#allocation7 + $0xb0] sm:$0xff] }
  0x5d   :  { %561 = vmatpush1.bf16.msra.mxu1 %v560_v57  ;;  %v570_v17 = vpack.c.bf16 %v221_v14, %v219_v13  ;;  %v223_v20 = vld [vmem:[#allocation7 + $0xc8] sm:$0xff]  ;;  %v225_v21 = vld [vmem:[#allocation7 + $0xd8] sm:$0xff]  ;;  %v572_v22 = vpack.c.bf16 %v220_v19, %v218_v18  ;;  %v222_v25 = vld [vmem:[#allocation7 + $0xc0] sm:$0xff] }
  0x5e   :  { %537 = vmatpush1.bf16.msra.mxu0 %v536_v46  ;;  %563 = vmatprep.subr.bf16.mxu1 %v562_v60  ;;  %v80_v23 = vld [vmem:[#allocation2] sm:$0xff]  ;;  %v574_v24 = vpack.c.bf16 %v225_v21, %v223_v20  ;;  %v224_v26 = vld [vmem:[#allocation7 + $0xd0] sm:$0xff]  ;;  %v227_v27 = vld [vmem:[#allocation7 + $0xe8] sm:$0xff] }
  0x5f   :  { %539 = vmatprep.subr.bf16.mxu0 %v538_v51  ;;  %v229_v28 = vld [vmem:[#allocation7 + $0xf8] sm:$0xff]  ;;  %v576_v29 = vpack.c.bf16 %v224_v26, %v222_v25  ;;  %v226_v31 = vld [vmem:[#allocation7 + $0xe0] sm:$0xff]  ;;  %v228_v32 = vld [vmem:[#allocation7 + $0xf0] sm:$0xff] }
  0x60   :  { %v578_v30 = vpack.c.bf16 %v229_v28, %v227_v27  ;;  %v231_v33 = vld [vmem:[#allocation7 + $0x108] sm:$0xff]  ;;  %v233_v34 = vld [vmem:[#allocation7 + $0x118] sm:$0xff]  ;;  %v580_v35 = vpack.c.bf16 %v228_v32, %v226_v31  ;;  %v230_v37 = vld [vmem:[#allocation7 + $0x100] sm:$0xff] }
  0x61   :  { %565 = vmatpush1.bf16.msra.mxu1 %v564_v5  ;;  %v582_v36 = vpack.c.bf16 %v233_v34, %v231_v33  ;;  %v232_v38 = vld [vmem:[#allocation7 + $0x110] sm:$0xff]  ;;  %v235_v39 = vld [vmem:[#allocation7 + $0x128] sm:$0xff]  ;;  %v237_v40 = vld [vmem:[#allocation7 + $0x138] sm:$0xff] }
  0x62   :  { %541 = vmatpush1.bf16.msra.mxu0 %v540_v58  ;;  %567 = vmatprep.subr.bf16.mxu1 %v566_v8  ;;  %v584_v41 = vpack.c.bf16 %v232_v38, %v230_v37  ;;  %v586_v42 = vpack.c.bf16 %v237_v40, %v235_v39  ;;  %v234_v43 = vld [vmem:[#allocation7 + $0x120] sm:$0xff]  ;;  %v236_v44 = vld [vmem:[#allocation7 + $0x130] sm:$0xff]  ;;  %v239_v45 = vld [vmem:[#allocation7 + $0x148] sm:$0xff] }
  0x63   :  { %543 = vmatprep.subr.bf16.mxu0 %v542_v63  ;;  %v241_v46 = vld [vmem:[#allocation7 + $0x158] sm:$0xff]  ;;  %v588_v47 = vpack.c.bf16 %v236_v44, %v234_v43  ;;  %v238_v49 = vld [vmem:[#allocation7 + $0x140] sm:$0xff]  ;;  %v240_v50 = vld [vmem:[#allocation7 + $0x150] sm:$0xff] }
  0x64   :  { %v590_v48 = vpack.c.bf16 %v241_v46, %v239_v45  ;;  %v243_v51 = vld [vmem:[#allocation7 + $0x168] sm:$0xff]  ;;  %v245_v52 = vld [vmem:[#allocation7 + $0x178] sm:$0xff]  ;;  %v592_v53 = vpack.c.bf16 %v240_v50, %v238_v49  ;;  %v242_v55 = vld [vmem:[#allocation7 + $0x160] sm:$0xff] }
  0x65   :  { %569 = vmatpush1.bf16.msra.mxu1 %v568_v15  ;;  %v594_v54 = vpack.c.bf16 %v245_v52, %v243_v51  ;;  %v244_v56 = vld [vmem:[#allocation7 + $0x170] sm:$0xff]  ;;  %v247_v57 = vld [vmem:[#allocation7 + $0x188] sm:$0xff]  ;;  %v249_v58 = vld [vmem:[#allocation7 + $0x198] sm:$0xff] }
  0x66   :  { %545 = vmatpush1.bf16.msra.mxu0 %v544_v6  ;;  %571 = vmatprep.subr.bf16.mxu1 %v570_v17  ;;  %v596_v59 = vpack.c.bf16 %v244_v56, %v242_v55  ;;  %v598_v60 = vpack.c.bf16 %v249_v58, %v247_v57  ;;  %v246_v61 = vld [vmem:[#allocation7 + $0x180] sm:$0xff]  ;;  %v248_v62 = vld [vmem:[#allocation7 + $0x190] sm:$0xff]  ;;  %v251_v63 = vld [vmem:[#allocation7 + $0x1a8] sm:$0xff]  ;;  %v115_v57 = vlaneseq }
  0x67   :  { %547 = vmatprep.subr.bf16.mxu0 %v546_v11  ;;  %v253_v0 = vld [vmem:[#allocation7 + $0x1b8] sm:$0xff]  ;;  %v600_v1 = vpack.c.bf16 %v248_v62, %v246_v61  ;;  %v250_v3 = vld [vmem:[#allocation7 + $0x1a0] sm:$0xff]  ;;  %v252_v4 = vld [vmem:[#allocation7 + $0x1b0] sm:$0xff] }
  0x68   :  { %v602_v2 = vpack.c.bf16 %v253_v0, %v251_v63  ;;  %v255_v5 = vld [vmem:[#allocation7 + $0x1c8] sm:$0xff]  ;;  %v257_v6 = vld [vmem:[#allocation7 + $0x1d8] sm:$0xff]  ;;  %v604_v7 = vpack.c.bf16 %v252_v4, %v250_v3  ;;  %v254_v9 = vld [vmem:[#allocation7 + $0x1c0] sm:$0xff]  ;;  %v116_v58 = vshrl.u32 %v115_v57, 7 }
  0x69   :  { %573 = vmatpush1.bf16.msra.mxu1 %v572_v22  ;;  %v606_v8 = vpack.c.bf16 %v257_v6, %v255_v5  ;;  %v256_v10 = vld [vmem:[#allocation7 + $0x1d0] sm:$0xff]  ;;  %v259_v12 = vld [vmem:[#allocation7 + $0x1e8] sm:$0xff]  ;;  %v261_v13 = vld [vmem:[#allocation7 + $0x1f8] sm:$0xff] }
  0x6a   :  { %549 = vmatpush1.bf16.msra.mxu0 %v548_v16  ;;  %575 = vmatprep.subr.bf16.mxu1 %v574_v24  ;;  %v608_v11 = vpack.c.bf16 %v256_v10, %v254_v9  ;;  %v610_v14 = vpack.c.bf16 %v261_v13, %v259_v12  ;;  %v258_v15 = vld [vmem:[#allocation7 + $0x1e0] sm:$0xff]  ;;  %v260_v16 = vld [vmem:[#allocation7 + $0x1f0] sm:$0xff]  ;;  %v364_v19 = vld [vmem:[#allocation8 + $0x88] sm:$0xff]  ;;  %v121_v61 = vsub.s32 1, %v116_v58 }
  0x6b   :  { %v612_v17 = vpack.c.bf16 %v260_v16, %v258_v15  ;;  %v363_v18 = vld [vmem:[#allocation8 + $0x80] sm:$0xff]  ;;  %v348_v22 = vld [vmem:[#allocation8 + $0x8] sm:$0xff]  ;;  %v366_v24 = vld [vmem:[#allocation8 + $0x98] sm:$0xff] }
  0x6c   :  { %v347_v20 = vld [vmem:[#allocation8] sm:$0xff]  ;;  %v614_v21 = vpack.c.bf16 %v364_v19, %v363_v18  ;;  %v349_v27 = vld [vmem:[#allocation8 + $0x10] sm:$0xff]  ;;  %v350_v28 = vld [vmem:[#allocation8 + $0x18] sm:$0xff] }
  0x6d   :  { %190 = vmatmul.mubr.f32.vlgmr.msra.gmra.mrb[0].mxu0 %v80_v23  ;;  %577 = vmatpush1.bf16.msra.mxu1 %v576_v29  ;;  %v365_v23 = vld [vmem:[#allocation8 + $0x90] sm:$0xff]  ;;  %v616_v25 = vpack.c.bf16 %v348_v22, %v347_v20  ;;  %v367_v29 = vld [vmem:[#allocation8 + $0xa0] sm:$0xff]  ;;  %v620_v31 = vpack.c.bf16 %v350_v28, %v349_v27  ;;  %v352_v34 = vld [vmem:[#allocation8 + $0x28] sm:$0xff] }
  0x6e   :  { %579 = vmatprep.subr.bf16.mxu1 %v578_v30  ;;  %v618_v26 = vpack.c.bf16 %v366_v24, %v365_v23  ;;  %615 = vmatprep.subr.bf16.mxu0 %v614_v21  ;;  %v368_v30 = vld [vmem:[#allocation8 + $0xa8] sm:$0xff]  ;;  %v351_v33 = vld [vmem:[#allocation8 + $0x20] sm:$0xff]  ;;  %v353_v39 = vld [vmem:[#allocation8 + $0x30] sm:$0xff] }
  0x6f   :  { %617 = vmatpush3.bf16.msra.mxu0 %v616_v25  ;;  %v622_v32 = vpack.c.bf16 %v368_v30, %v367_v29  ;;  %v624_v37 = vpack.c.bf16 %v352_v34, %v351_v33  ;;  %v354_v40 = vld [vmem:[#allocation8 + $0x38] sm:$0xff]  ;;  %v355_v45 = vld [vmem:[#allocation8 + $0x40] sm:$0xff]  ;;  %v356_v46 = vld [vmem:[#allocation8 + $0x48] sm:$0xff]  ;;  %v461_v30 = vand.u32 127, %v115_v57 }
  0x70   :  { %619 = vmatprep.subr.bf16.mxu0 %v618_v26  ;;  %v628_v43 = vpack.c.bf16 %v354_v40, %v353_v39  ;;  %v632_v49 = vpack.c.bf16 %v356_v46, %v355_v45  ;;  %v357_v51 = vld [vmem:[#allocation8 + $0x50] sm:$0xff]  ;;  %v358_v52 = vld [vmem:[#allocation8 + $0x58] sm:$0xff]  ;;  %v359_v6 = vld [vmem:[#allocation8 + $0x60] sm:$0xff] }
  0x71   :  { %581 = vmatpush1.bf16.msra.mxu1 %v580_v35  ;;  %v369_v35 = vld [vmem:[#allocation8 + $0xb0] sm:$0xff]  ;;  %v636_v55 = vpack.c.bf16 %v358_v52, %v357_v51  ;;  %v378_v10 = vld [vmem:[#allocation8 + $0xf8] sm:$0xff]  ;;  %vm462_vm0 = vcmp.ge.s32.totalorder %v461_v30, 64 }
  0x72   :  { %583 = vmatprep.subr.bf16.mxu1 %v582_v36  ;;  %v370_v36 = vld [vmem:[#allocation8 + $0xb8] sm:$0xff]  ;;  %v377_v9 = vld [vmem:[#allocation8 + $0xf0] sm:$0xff] }
  0x73   :  { %621 = vmatpush3.bf16.msra.mxu0 %v620_v31  ;;  %v626_v38 = vpack.c.bf16 %v370_v36, %v369_v35  ;;  %v361_v12 = vld [vmem:[#allocation8 + $0x70] sm:$0xff]  ;;  %v362_v13 = vld [vmem:[#allocation8 + $0x78] sm:$0xff] }
  0x74   :  { %623 = vmatprep.subr.bf16.mxu0 %v622_v32  ;;  %v262_v15 = vld [vmem:[%s905_s4] sm:$0x3]  ;;  %s785_s4 = smov [#allocation10]  }
  0x75   :  { %585 = vmatpush1.bf16.msra.mxu1 %v584_v41  ;;  %v371_v41 = vld [vmem:[#allocation8 + $0xc0] sm:$0xff]  ;;  %v482_v25 = vld [vmem:[%s907_s6] ss:$0 sm:$0xff]  ;;  %s471_s30 = sshll.u32 %s785_s4, 4  ;;  %s472_s30 = int_to_ptr.vmem [resolvable:$true] %s471_s30 }
  0x76   :  { %587 = vmatprep.subr.bf16.mxu1 %v586_v42  ;;  %v372_v42 = vld [vmem:[#allocation8 + $0xc8] sm:$0xff]  ;;  %s746_s8 = scalar_lea.vmem %s472_s30, 128  ;;  %p751_p5 = scmp.lt.s32.totalorder %s472_s30, %s472_s30 }
  0x77   :  { %625 = vmatpush3.bf16.msra.mxu0 %v624_v37  ;;  %v630_v44 = vpack.c.bf16 %v372_v42, %v371_v41  ;;  %p747_p4 = scmp.ne.s32.totalorder %s472_s30, %s746_s8  ;;  %p752_p6 = scmp.lt.s32.totalorder %s746_s8, %s746_s8 }
  0x78   :  { %627 = vmatprep.subr.bf16.mxu0 %v626_v38 }
  0x79   :  { %589 = vmatpush1.bf16.msra.mxu1 %v588_v47  ;;  %v373_v47 = vld [vmem:[#allocation8 + $0xd0] sm:$0xff]  ;;  %p753_p7 = por %p752_p6, %p751_p5 }
  0x7a   :  { %591 = vmatprep.subr.bf16.mxu1 %v590_v48  ;;  %v374_v48 = vld [vmem:[#allocation8 + $0xd8] sm:$0xff] }
  0x7b   :  { %629 = vmatpush3.bf16.msra.mxu0 %v628_v43  ;;  %v634_v50 = vpack.c.bf16 %v374_v48, %v373_v47  ;;  %p754_p8 = pnand %p753_p7, %p747_p4 }
  0x7c   :  { %631 = vmatprep.subr.bf16.mxu0 %v630_v44 }
  0x7d   :  { %593 = vmatpush1.bf16.msra.mxu1 %v592_v53  ;;  %v375_v53 = vld [vmem:[#allocation8 + $0xe0] sm:$0xff] }
  0x7e   :  { %595 = vmatprep.subr.bf16.mxu1 %v594_v54  ;;  %v376_v54 = vld [vmem:[#allocation8 + $0xe8] sm:$0xff] }
  0x7f   :  { %633 = vmatpush3.bf16.msra.mxu0 %v632_v49  ;;  %v638_v56 = vpack.c.bf16 %v376_v54, %v375_v53 }
  0x80   :  { %635 = vmatprep.subr.bf16.mxu0 %v634_v50 }
  0x81   :  { %597 = vmatpush1.bf16.msra.mxu1 %v596_v59  ;;  %v117_v59 = vsub.s32 0, %v116_v58 }
  0x82   :  { %599 = vmatprep.subr.bf16.mxu1 %v598_v60  ;;  %v113_v60 = vld [vmem:[%s903_s2] sm:$0x3] }
  0x83   :  { %637 = vmatpush3.bf16.msra.mxu0 %v636_v55  ;;  %v118_v62 = vrot.slane %v113_v60, %v117_v59  ;;  %v122_v63 = vrot.slane %v113_v60, %v121_v61  ;;  %v267_v16 = vrot.slane %v262_v15, %v117_v59 }
  0x84   :  { %639 = vmatprep.subr.bf16.mxu0 %v638_v56 }
  0x85   :  { %601 = vmatpush1.bf16.msra.mxu1 %v600_v1 }
  0x86   :  { %603 = vmatprep.subr.bf16.mxu1 %v602_v2 }
  0x89   :  { %605 = vmatpush1.bf16.msra.mxu1 %v604_v7  ;;  %v360_v7 = vld [vmem:[#allocation8 + $0x68] sm:$0xff] }
  0x8a   :  { %607 = vmatprep.subr.bf16.mxu1 %v606_v8  ;;  %v640_v8 = vpack.c.bf16 %v360_v7, %v359_v6 }
  0x8c   :  { %641 = vmatpush3.bf16.msra.mxu0 %v640_v8 }
  0x8d   :  { %609 = vmatpush1.bf16.msra.mxu1 %v608_v11  ;;  %v642_v11 = vpack.c.bf16 %v378_v10, %v377_v9 }
  0x8e   :  { %611 = vmatprep.subr.bf16.mxu1 %v610_v14  ;;  %v644_v14 = vpack.c.bf16 %v362_v13, %v361_v12 }
  0x8f   :  { %643 = vmatprep.subr.bf16.mxu0 %v642_v11 }
  0x90   :  { %645 = vmatpush3.bf16.msra.mxu0 %v644_v14 }
  0x91   :  { %613 = vmatpush1.bf16.msra.mxu1 %v612_v17  ;;  %v271_v17 = vrot.slane %v262_v15, %v121_v61 }
 0x140   :  { %v191_v0 = vpop.f32.mrb[0].mxu0 }
 0x141   :  { %v192_v1 = vadd.f32 %v191_v0, %v118_v62  ;;  %v193_v2 = vpop.f32.mrb[1].mxu0 }
 0x142   :  { %v194_v3 = vadd.f32 %v193_v2, %v122_v63 }
 0x143   :  { %v196_v5 = vmax.f32 %v192_v1, 0.0 }
 0x144   :  { %v197_v4 = vmax.f32 %v194_v3, 0.0 }
 0x146   :  { %338 = vmatprep.mubr.f32.mxu1 %v197_v4 }
 0x147   :  { %339 = vmatmul.mubr.f32.vlgmr.msra.gmra.mrb[0].mxu1 %v196_v5 }
 0x21a   :  { %v340_v18 = vpop.f32.mrb[0].mxu1 }
 0x21b   :  { %v341_v19 = vadd.f32 %v340_v18, %v267_v16  ;;  %v342_v20 = vpop.f32.mrb[1].mxu1 }
 0x21c   :  { %v343_v21 = vadd.f32 %v342_v20, %v271_v17 }
 0x21d   :  { %v345_v23 = vmax.f32 %v341_v19, 0.0 }
 0x21e   :  { %v346_v22 = vmax.f32 %v343_v21, 0.0 }
 0x220   :  { %450 = vmatprep.mubr.f32.mxu0 %v346_v22 }
 0x221   :  { %451 = vmatmul.mubr.f32.vlgmr.msra.gmra.mrb[2].mxu0 %v345_v23 }
 0x2f4   :  { %v515_v24 = vpop.f32.mrb[2].mxu0 }
 0x2f5   :  { %v516_v26 = vpop.f32.mrb[3].mxu0 }
 0x2f6   :  { %v517_v27 = vadd.f32 %v516_v26, %v515_v24 }
 0x2f8   :  { %v453_v28 = vadd.f32 %v517_v27, %v482_v25 }
 0x2fa   :  { %656 = vtanh.f32 %v453_v28 }
 0x304   :  { %v657_v29 = vpop.eup %656 }
 0x305   :  { %v457_v31 = vadd.f32 1.0, %v657_v29 }
 0x307   :  { %v458_v32 = vmul.f32 11.0, %v457_v31 }
 0x309   :  { %v459_v33 = vadd.f32 -20.0, %v458_v32 }
 0x30b   :  { %v463_v34 = vsel %vm462_vm0, %v459_v33, %v453_v28 }
 0x30c   :  { %464 = vst [vmem:[#allocation10] sm:$0xff] %v463_v34 }
 0x30d   :  { %757 = shalt.err (!%p754_p8)
}
 0x30e   :  { %s758_s10 = scalar_lea.hbm %s908_s7, 128 }
 0x30f   :  { %p759_p9 = scmp.ne.s32.totalorder %s908_s7, %s758_s10  ;;  %p762_p10 = scmp.lt.u32.totalorder %s758_s10, %s908_s7 }
 0x311   :  { %p764_p11 = pnand %p762_p10, %p759_p9 }
 0x313   :  { %767 = shalt.err (!%p764_p11)
}
 0x314   :  { %474 = dma.vmem_to_hbm [thread:$0]  %s472_s30, 128, %s908_s7, [#allocation4]  }
 0x315   :  { %774 = dma.done.wait [#allocation4], 128  }
 0x316   :  { %775 = vsyncadd [#allocation4], 4294967168 }
 0x317   :  { %478 = vsyncpa [#allocation3], 1 }
 0x318   :  { %479 = vsyncpa [#allocation6], 1 }
 0x319   :  { %480 = vsyncpa [#allocation9], 1 }
 0x31a   :  { %481 = vsyncpa [#allocation4], 1 }

</bundles_post_ra>
